<compile_context>
chip_gen: v6e
topology: v6e:2x2x1
jax: 0.10.0
libtpu: 0.0.40
codegen_flags: <defaults>
</compile_context>

<pallas_src>
import numpy as np
import jax
import jax.numpy as jnp
from jax.experimental import pallas as pl
from jax.experimental.pallas import tpu as pltpu


# ----------------------------------------------------------------------------
# Interpolation matrices
# ----------------------------------------------------------------------------
def upsample_matrix(s: int) -> np.ndarray:
    """Dense (2s, s) linear upsample-by-2 matrix (align_corners=False)."""
    u = np.zeros((2 * s, s), dtype=np.float32)
    for i in range(s):
        u[2 * i, i] += 0.75
        u[2 * i, max(i - 1, 0)] += 0.25
        u[2 * i + 1, i] += 0.75
        u[2 * i + 1, min(i + 1, s - 1)] += 0.25
    return u


# ----------------------------------------------------------------------------
# Kernels
# ----------------------------------------------------------------------------
def _d_stencil(x, xp, xn):
    """2-tap upsample stencil along axis 1 (the D axis). x:(C,Db,...), halos:(C,1,...)."""
    Db = x.shape[1]
    if Db > 1:
        down = jnp.concatenate([xp, x[:, :-1]], axis=1)   # x[max(d-1,0)]
        up = jnp.concatenate([x[:, 1:], xn], axis=1)      # x[min(d+1,D-1)]
    else:
        down, up = xp, xn
    even = 0.25 * down + 0.75 * x
    odd = 0.75 * x + 0.25 * up
    y = jnp.stack([even, odd], axis=2)                    # sublane/leading interleave
    return y.reshape((x.shape[0], 2 * Db) + x.shape[2:])


def _general_body(x, xp, xn, w, o_ref):
    # x : (C_blk, D_blk, H, W) in compute dtype; w : (W, 2W); o_ref : (C,2Db,2H,2W)
    C, Db, H, W = x.shape
    y = _d_stencil(x, xp, xn)                              # (C, 2Db, H, W)

    # H axis: 2-tap stencil (VPU) along the sublane axis.
    if H > 1:
        down_h = jnp.concatenate([y[:, :, :1], y[:, :, :-1]], axis=2)
        up_h = jnp.concatenate([y[:, :, 1:], y[:, :, -1:]], axis=2)
    else:
        down_h, up_h = y, y
    even_h = 0.25 * down_h + 0.75 * y
    odd_h = 0.75 * y + 0.25 * up_h
    y = jnp.stack([even_h, odd_h], axis=3).reshape(C, 2 * Db, 2 * H, W)

    # W axis: single non-batched matmul on the MXU (interleave baked into columns).
    y2 = y.reshape(C * 2 * Db * 2 * H, W)
    out = jnp.dot(y2, w, preferred_element_type=jnp.float32)      # (M, 2W)
    o_ref[...] = out.reshape(C, 2 * Db, 2 * H, 2 * W).astype(o_ref.dtype)


def _general_kernel_halo(xp_ref, x_ref, xn_ref, w_ref, o_ref):
    cdt = w_ref.dtype
    _general_body(x_ref[...].astype(cdt), xp_ref[...].astype(cdt),
                  xn_ref[...].astype(cdt), w_ref[...], o_ref)


def _general_kernel(x_ref, w_ref, o_ref):
    cdt = w_ref.dtype
    x = x_ref[...].astype(cdt)
    _general_body(x, x[:, :1], x[:, -1:], w_ref[...], o_ref)


def _fused_kernel(x_ref, w_ref, o_ref):
    # x_ref: (C_blk, D, H*W) ; w_ref: (H*W, 4*H*W) = kron(UH,UW)^T ; o_ref: (C_blk, 2D, 4HW)
    cdt = w_ref.dtype
    x = x_ref[...].astype(cdt)
    C, Db, _ = x.shape
    y = _d_stencil(x, x[:, :1], x[:, -1:])                 # (C, 2Db, HW)
    y2 = y.reshape(C * 2 * Db, y.shape[-1])
    out = jnp.dot(y2, w_ref[...], preferred_element_type=jnp.float32)  # (C*2Db, 4HW)
    o_ref[...] = out.reshape(C, 2 * Db, -1).astype(o_ref.dtype)        # lane-dense store


# ----------------------------------------------------------------------------
# Wrapper / tiling
# ----------------------------------------------------------------------------
def _largest_divisor_leq(n: int, cap: int) -> int:
    cap = max(1, min(n, cap))
    for b in range(cap, 0, -1):
        if n % b == 0:
            return b
    return 1


def _vmem_limit_bytes() -> int:
    cap = 64 * 1024 * 1024                       # conservative fallback (v7x per-core)
    try:
        info = pltpu.get_tpu_info()
        cap = int(getattr(info, "vmem_capacity_bytes", cap) or cap)
    except Exception:
        pass
    return min(int(cap * 0.85), 100 * 1024 * 1024)


def upsample_trilinear_x2(x: jax.Array, *, c_blk: int | None = None,
                          d_blk: int | None = None,
                          vmem_budget_bytes: int | None = None) -> jax.Array:
    """x: (N, C, D, H, W) -> (N, C, 2D, 2H, 2W), trilinear, align_corners=False."""
    assert x.ndim == 5, "expected a 5D NCDHW tensor"
    N, C, D, H, W = x.shape
    hw = H * W
    in_item = jnp.dtype(x.dtype).itemsize
    out_item = in_item
    cdt = jnp.bfloat16 if x.dtype == jnp.bfloat16 else jnp.float32
    c_item = jnp.dtype(cdt).itemsize
    forced = (c_blk is not None) or (d_blk is not None)

    vmem_limit = _vmem_limit_bytes()

    # Fused lane-dense path: only when the general path's stores would be masked
    # (2W not a 128-multiple), the fused output is lane-dense (4HW % 128 == 0) and
    # the kron matrix / MXU work stays small. It holds the full D per block.
    fused = ((2 * W) % 128 != 0 and (4 * hw) % 128 == 0 and hw <= 256
             and (d_blk is None or d_blk == D))

    def _max_elems(fused_flag: bool) -> int:
        if fused_flag:
            wr, wc, inter = hw, 4 * hw, 8
        else:
            wr, wc, inter = W, 2 * W, 20
        w_bytes = wr * wc * c_item
        # Per input-block element: double-buffered input (+halo slack), double-
        # buffered 8x output, live compute-dtype intermediates, f32 matmul temp.
        per_elem = 6 * in_item + 16 * out_item + inter * c_item + 16 * 4
        budget = (vmem_budget_bytes if vmem_budget_bytes is not None
                  else max(int(vmem_limit * 0.7) - 2 * w_bytes, 1 << 20))
        return max(budget // per_elem, 1)

    max_elems = _max_elems(fused)
    if fused and D * hw > max_elems:
        fused = False                      # whole-D fused block does not fit -> tile D instead
        max_elems = _max_elems(False)

    if fused:
        d_blk = D
        if c_blk is None:
            c_blk = _largest_divisor_leq(C, max(max_elems // (D * hw), 1))
    else:
        if d_blk is None:
            d_blk = _largest_divisor_leq(D, max(max_elems // hw, 1))
        if c_blk is None:
            c_blk = _largest_divisor_leq(C, max(max_elems // (d_blk * hw), 1))
    assert D % d_blk == 0 and C % c_blk == 0

    # v7x megacore: avoid a degenerate single-program parallel grid when auto-picking.
    if not forced and N * (C // c_blk) * (D // d_blk) == 1:
        if (not fused) and d_blk % 2 == 0:
            d_blk //= 2
        elif c_blk % 2 == 0:
            c_blk //= 2

    # Grid ordered with the largest parallel extent first (better megacore split).
    extents = {"n": N, "c": C // c_blk, "d": D // d_blk}
    order = sorted(("n", "c", "d"), key=lambda a: -extents[a])
    pos = {a: i for i, a in enumerate(order)}
    grid = tuple(extents[a] for a in order)

    def remap(fn):
        def index_map(*g):
            return fn(g[pos["n"]], g[pos["c"]], g[pos["d"]])
        return index_map

    cparams = pltpu.CompilerParams(
        dimension_semantics=("parallel", "parallel", "parallel"),
        vmem_limit_bytes=int(vmem_limit))

    if fused:
        kmat = jnp.asarray(np.kron(upsample_matrix(H).T, upsample_matrix(W).T),
                           dtype=cdt)                       # (HW, 4HW), exact in bf16
        x4 = x.reshape(N, C, D, hw)                          # free row-major collapse
        out = pl.pallas_call(
            _fused_kernel,
            out_shape=jax.ShapeDtypeStruct((N, C, 2 * D, 4 * hw), x.dtype),
            grid_spec=pltpu.PrefetchScalarGridSpec(
                num_scalar_prefetch=0,
                grid=grid,
                in_specs=[
                    pl.BlockSpec((None, c_blk, D, hw),
                                 remap(lambda n, c, d: (n, c, 0, 0))),
                    pl.BlockSpec((hw, 4 * hw), remap(lambda n, c, d: (0, 0))),
                ],
                out_specs=pl.BlockSpec((None, c_blk, 2 * D, 4 * hw),
                                       remap(lambda n, c, d: (n, c, 0, 0))),
            ),
            compiler_params=cparams,
        )(x4, kmat)
        return out.reshape(N, C, 2 * D, 2 * H, 2 * W)        # free row-major split

    # ---- general path ----
    uwT = jnp.asarray(upsample_matrix(W).T, dtype=cdt)       # (W, 2W)
    w_spec = pl.BlockSpec((W, 2 * W), remap(lambda n, c, d: (0, 0)))
    x_spec = pl.BlockSpec((None, c_blk, d_blk, H, W),
                          remap(lambda n, c, d: (n, c, d, 0, 0)))
    o_spec = pl.BlockSpec((None, c_blk, 2 * d_blk, 2 * H, 2 * W),
                          remap(lambda n, c, d: (n, c, d, 0, 0)))
    out_shape = jax.ShapeDtypeStruct((N, C, 2 * D, 2 * H, 2 * W), x.dtype)

    if d_blk == D:
        # D not tiled: no halo DMAs / buffers needed.
        return pl.pallas_call(
            _general_kernel, out_shape=out_shape,
            grid_spec=pltpu.PrefetchScalarGridSpec(
                num_scalar_prefetch=0, grid=grid,
                in_specs=[x_spec, w_spec], out_specs=o_spec),
            compiler_params=cparams,
        )(x, uwT)

    prev_spec = pl.BlockSpec(
        (None, c_blk, 1, H, W),
        remap(lambda n, c, d: (n, c, jnp.maximum(d * d_blk - 1, 0), 0, 0)))
    next_spec = pl.BlockSpec(
        (None, c_blk, 1, H, W),
        remap(lambda n, c, d: (n, c, jnp.minimum(d * d_blk + d_blk, D - 1), 0, 0)))
    return pl.pallas_call(
        _general_kernel_halo, out_shape=out_shape,
        grid_spec=pltpu.PrefetchScalarGridSpec(
            num_scalar_prefetch=0, grid=grid,
            in_specs=[prev_spec, x_spec, next_spec, w_spec], out_specs=o_spec),
        compiler_params=cparams,
    )(x, x, x, uwT)


def upsample(x: jax.Array, scale_factor: int = 2, mode: str = "trilinear") -> jax.Array:
    """Equivalent of the PyTorch Upsample module's forward (default config)."""
    if scale_factor != 2 or mode != "trilinear" or x.ndim != 5:
        # TODO(synk): other scale factors / modes ('nearest','linear','bilinear') not implemented.
        raise NotImplementedError("only scale_factor=2, mode='trilinear' on NCDHW is implemented")
    return upsample_trilinear_x2(x)


# ----------------------------------------------------------------------------
# Pure-JAX reference & tests
# ----------------------------------------------------------------------------
def _reference_upsample(x: jax.Array) -> jax.Array:
    N, C, D, H, W = x.shape
    ud = jnp.asarray(upsample_matrix(D))
    uh = jnp.asarray(upsample_matrix(H))
    uw = jnp.asarray(upsample_matrix(W))
    y = jnp.einsum('od,ncdhw->ncohw', ud, x.astype(jnp.float32))
    y = jnp.einsum('ph,ncohw->ncopw', uh, y)
    y = jnp.einsum('qw,ncopw->ncopq', uw, y)
    return y.astype(x.dtype)


if __name__ == "__main__":
    key = jax.random.PRNGKey(0)
    N, C, D, H, W = 2, 4, 4, 8, 16
    x = jax.random.normal(key, (N, C, D, H, W), dtype=jnp.float32)
    ref = _reference_upsample(x)

    # 1) Auto blocks: fused lane-dense path (2W < 128, 4*H*W % 128 == 0).
    out = jax.block_until_ready(upsample(x))
    assert out.shape == (N, C, 2 * D, 2 * H, 2 * W), out.shape
    np.testing.assert_allclose(np.asarray(out), np.asarray(ref), rtol=1e-5, atol=1e-5)

    # 2) Forced small blocks: general path with C blocking and D-halo tiling.
    out2 = jax.block_until_ready(upsample_trilinear_x2(x, c_blk=2, d_blk=2))
    np.testing.assert_allclose(np.asarray(out2), np.asarray(ref), rtol=1e-5, atol=1e-5)

    # 3) bf16 input: bf16 stencils + bf16 MXU weights (fused path).
    xb = x.astype(jnp.bfloat16)
    refb = np.asarray(_reference_upsample(xb).astype(jnp.float32))
    outb = jax.block_until_ready(upsample_trilinear_x2(xb))
    np.testing.assert_allclose(np.asarray(outb.astype(jnp.float32)), refb,
                               rtol=5e-2, atol=5e-2)

    # 4) Lane-dense W already (2W == 128): general path, no halos, reordered grid.
    x2 = jax.random.normal(jax.random.PRNGKey(0), (1, 2, 4, 4, 64), dtype=jnp.float32)
    ref2 = _reference_upsample(x2)
    out4 = jax.block_until_ready(upsample_trilinear_x2(x2, c_blk=1, d_blk=4))
    np.testing.assert_allclose(np.asarray(out4), np.asarray(ref2), rtol=1e-5, atol=1e-5)

    print("KERNEL_OK")
</pallas_src>

<mosaic_0001>
module attributes {stable_mosaic.version = 11 : i64} {
  func.func @_fused_kernel(%arg0: i32, %arg1: i32, %arg2: i32, %arg3: memref<1x4x4x128xf32, #tpu.memory_space<vmem>>, %arg4: memref<128x512xf32, #tpu.memory_space<vmem>>, %arg5: memref<1x4x8x512xf32, #tpu.memory_space<vmem>>) attributes {dimension_semantics = [#tpu.dimension_semantics<parallel>, #tpu.dimension_semantics<parallel>, #tpu.dimension_semantics<parallel>], iteration_bounds = array<i64: 2, 1, 1>, scalar_prefetch = 0 : i64, scratch_operands = 0 : i64, tpu.core_type = #tpu.core_type<tc>, window_params = [{transform_indices = @transform_0, window_bounds = array<i64: 1, 4, 4, 128>}, {pipeline_mode = #tpu.pipeline_mode<synchronous>, transform_indices = @transform_1, window_bounds = array<i64: 128, 512>}, {transform_indices = @transform_2, window_bounds = array<i64: 1, 4, 8, 512>}]} {
    %c0 = arith.constant 0 : index
    %c0_0 = arith.constant 0 : index
    %c0_1 = arith.constant 0 : index
    %c0_2 = arith.constant 0 : index
    %0 = vector.load %arg3[%c0, %c0_0, %c0_1, %c0_2] : memref<1x4x4x128xf32, #tpu.memory_space<vmem>>, vector<1x4x4x128xf32>
    %1 = vector.shape_cast %0 : vector<1x4x4x128xf32> to vector<4x4x128xf32>
    %2 = vector.extract_strided_slice %1 {offsets = [0, 0, 0], sizes = [4, 1, 128], strides = [1, 1, 1]} : vector<4x4x128xf32> to vector<4x1x128xf32>
    %3 = vector.extract_strided_slice %1 {offsets = [0, 3, 0], sizes = [4, 1, 128], strides = [1, 1, 1]} : vector<4x4x128xf32> to vector<4x1x128xf32>
    %4 = vector.extract_strided_slice %1 {offsets = [0, 0, 0], sizes = [4, 3, 128], strides = [1, 1, 1]} : vector<4x4x128xf32> to vector<4x3x128xf32>
    %5 = tpu.concatenate %2, %4 in 1 : vector<4x1x128xf32>, vector<4x3x128xf32> -> vector<4x4x128xf32>
    %6 = vector.extract_strided_slice %1 {offsets = [0, 1, 0], sizes = [4, 3, 128], strides = [1, 1, 1]} : vector<4x4x128xf32> to vector<4x3x128xf32>
    %7 = tpu.concatenate %6, %3 in 1 : vector<4x3x128xf32>, vector<4x1x128xf32> -> vector<4x4x128xf32>
    %cst = arith.constant 2.500000e-01 : f32
    %8 = vector.broadcast %cst : f32 to vector<4x4x128xf32>
    %9 = arith.mulf %8, %5 : vector<4x4x128xf32>
    %cst_3 = arith.constant 7.500000e-01 : f32
    %10 = vector.broadcast %cst_3 : f32 to vector<4x4x128xf32>
    %11 = arith.mulf %10, %1 : vector<4x4x128xf32>
    %12 = arith.addf %9, %11 : vector<4x4x128xf32>
    %cst_4 = arith.constant 7.500000e-01 : f32
    %13 = vector.broadcast %cst_4 : f32 to vector<4x4x128xf32>
    %14 = arith.mulf %13, %1 : vector<4x4x128xf32>
    %cst_5 = arith.constant 2.500000e-01 : f32
    %15 = vector.broadcast %cst_5 : f32 to vector<4x4x128xf32>
    %16 = arith.mulf %15, %7 : vector<4x4x128xf32>
    %17 = arith.addf %14, %16 : vector<4x4x128xf32>
    %18 = vector.shape_cast %12 : vector<4x4x128xf32> to vector<4x4x1x128xf32>
    %19 = vector.shape_cast %17 : vector<4x4x128xf32> to vector<4x4x1x128xf32>
    %20 = tpu.concatenate %18, %19 in 2 : vector<4x4x1x128xf32>, vector<4x4x1x128xf32> -> vector<4x4x2x128xf32>
    %21 = vector.shape_cast %20 : vector<4x4x2x128xf32> to vector<4x8x128xf32>
    %22 = vector.shape_cast %21 : vector<4x8x128xf32> to vector<32x128xf32>
    %c0_6 = arith.constant 0 : index
    %c0_7 = arith.constant 0 : index
    %23 = vector.load %arg4[%c0_6, %c0_7] : memref<128x512xf32, #tpu.memory_space<vmem>>, vector<128x512xf32>
    %cst_8 = arith.constant dense<0.000000e+00> : vector<32x512xf32>
    %24 = tpu.matmul %22, %23, %cst_8 {dimension_numbers = #tpu.dot_dimension_numbers<[1], [0], [0], [1], [0, 0, 1, 1], [], []>} : vector<32x128xf32>, vector<128x512xf32>, vector<32x512xf32> -> vector<32x512xf32>
    %25 = vector.shape_cast %24 : vector<32x512xf32> to vector<4x8x512xf32>
    %c0_9 = arith.constant 0 : index
    %c0_10 = arith.constant 0 : index
    %c0_11 = arith.constant 0 : index
    %c0_12 = arith.constant 0 : index
    %26 = vector.load %arg5[%c0_9, %c0_10, %c0_11, %c0_12] : memref<1x4x8x512xf32, #tpu.memory_space<vmem>>, vector<1x4x8x512xf32>
    %27 = vector.shape_cast %26 : vector<1x4x8x512xf32> to vector<4x8x512xf32>
    %28 = vector.shape_cast %25 : vector<4x8x512xf32> to vector<1x4x8x512xf32>
    tpu.vector_store %arg5[%c0_9, %c0_10, %c0_11, %c0_12], %28 {strides = array<i32>} : memref<1x4x8x512xf32, #tpu.memory_space<vmem>>, vector<1x4x8x512xf32>,
    return
  }
  func.func @transform_0(%arg0: i32, %arg1: i32, %arg2: i32) -> (i32, i32, i32, i32) {
    %c0_i32 = arith.constant 0 : i32
    %c0_i32_0 = arith.constant 0 : i32
    %c0_i32_1 = arith.constant 0 : i32
    return %arg0, %arg1, %c0_i32, %c0_i32_0 : i32, i32, i32, i32
  }
  func.func @transform_1(%arg0: i32, %arg1: i32, %arg2: i32) -> (i32, i32) {
    %c0_i32 = arith.constant 0 : i32
    %c0_i32_0 = arith.constant 0 : i32
    %c0_i32_1 = arith.constant 0 : i32
    return %c0_i32, %c0_i32_0 : i32, i32
  }
  func.func @transform_2(%arg0: i32, %arg1: i32, %arg2: i32) -> (i32, i32, i32, i32) {
    %c0_i32 = arith.constant 0 : i32
    %c0_i32_0 = arith.constant 0 : i32
    %c0_i32_1 = arith.constant 0 : i32
    return %arg0, %arg1, %c0_i32, %c0_i32_0 : i32, i32, i32, i32
  }
}

</mosaic_0001>

<bundles_post_ra>
// kernel: tpu_custom_call.1
= control target key start
LH: loop header
LB: loop body
LE: loop exit
PB: predicated region body
PF: predicated region fallthrough
CT: control target
= control target key end

     0   :  { %7 = vsyncpa [#allocation3], 0  ;;  %s1606_s0 = inlined_call_operand.hbm [shape: f32[2,4,4,128], index: 0, kind: input, shape index: {}]   ;;  %s1607_s1 = inlined_call_operand.hbm [shape: f32[128,512], index: 1, kind: input, shape index: {}]   ;;  %s1608_s2 = inlined_call_operand.hbm [shape: f32[2,4,8,512], index: 2, kind: output, shape index: {}]  }
   0x1   :  { %9 = vsyncpa [#allocation3 + $0x1], 0 }
   0x2   :  { %10 = vsyncpa [#allocation6], 0 }
   0x3   :  { %11 = vsyncpa [#allocation4], 0 }
   0x4   :  { %13 = vsyncpa [#allocation4 + $0x1], 0  ;;  %s1298_s9 = smov 0   ;;  %s1300_s10 = smov 0  }
   0x5   :  { %s1302_s11 = smov 0   ;;  %s1304_s12 = smov 0  }
   0x6   :  { %s1306_s13 = smov 0   ;;  %s1308_s14 = smov 0  }
   0x7 LB: > { %s1030_s15 = sadd.s32 4294967295, %s1269_s14   ;;  %s1031_s16 = sadd.s32 4294967294, %s1269_s14   ;;  %s1269_s14 = sphi %s1308_s14, %s19_s14   ;;  %s1265_s13 = sphi %s1306_s13, %s1626_s13   ;;  %s1261_s12 = sphi %s1304_s12, %s1625_s12   ;;  %s1257_s11 = sphi %s1302_s11, %s1624_s11   ;;  %s1253_s10 = sphi %s1300_s10, %s1623_s10   ;;  %s1249_s9 = sphi %s1298_s9, %s1622_s9  }
   0x8   : > { %p60_p0 = scmp.ne.s32.totalorder %s1253_s10, %s1249_s9  ;;  %p1332_p1 = scmp.eq.s32.totalorder %s1030_s15, 0 }
   0x9   : > { %p1336_p2 = scmp.eq.s32.totalorder %s1030_s15, 1  ;;  %p113_p3 = scmp.eq.s32.totalorder %s1031_s16, 1 }
   0xa   : > { %p1342_p4 = por %p1332_p1, %p60_p0  ;;  %p1032_p5 = scmp.ge.s32.totalorder %s1269_s14, 1 }
   0xb   : > { %p1347_p6 = por %p113_p3, %p60_p0  ;;  %p120_p7 = scmp.lt.s32.totalorder %s1269_s14, 3 }
   0xc   : > { %s1612_s19 = scalar_select %p1342_p4, 1, 0 }
   0xd   : > { %s1613_s20 = scalar_select %p1347_p6, 1, 0 }
   0xe   : > { %p1352_p8 = pnand %p1032_p5, %p120_p7  ;;  %s1271_s22 = smov [#allocation5]  }
   0xf   : > { %s132_s23 = sshll.u32 %s1271_s22, 4  ;;  %s38_s25 = sadd.s32 1, %s1265_s13  ;;  %s133_s23 = int_to_ptr.vmem [resolvable:$true] %s132_s23 }
  0x10   : > { %p1057_p9 = pneg %p1352_p8  ;;  %s1142_s26 = scalar_lea.vmem %s133_s23, 8192 }
  0x11   : > { %p1143_p13 = scmp.ne.s32.totalorder %s133_s23, %s1142_s26  ;;  %p1150_p5 = scmp.lt.s32.totalorder %s133_s23, %s133_s23 }
  0x12   : > { %p1361_p11 = pnand %p1057_p9, %p1332_p1  ;;  %p1151_p7 = scmp.lt.s32.totalorder %s1142_s26, %s1142_s26 }
  0x14   : > { %p1133_p12 = pneg %p1361_p11  ;;  %p1152_p6 = por %p1151_p7, %p1150_p5 }
  0x16   : > { %p1145_p0 = pnand %p1143_p13, %p1133_p12 }
  0x18   : > { %p1146_p3 = pneg %p1145_p0 }
  0x1a   : > { %p1153_p4 = pnand %p1152_p6, %p1146_p3 }
  0x1c   : > { %1156 = shalt.err (!%p1153_p4)
}
  0x1d   : > { %s1272_s27 = smov 512   ;;  %s1273_s28 = smov 32  }
  0x1e   : > { %1060 = dma.hbm_to_vmem [thread:$0]  (!%p1361_p11), %s1607_s1, 8192, %s133_s23, [#allocation6], %s1272_s27, %s1272_s27, %s1273_s28  }
  0x1f   : > { %p40_p6 = scmp.ge.s32.totalorder %s38_s25, 2  ;;  %s47_s3 = sadd.s32 1, %s1257_s11 }
  0x20   : > { %p54_p4 = scmp.ne.s32.totalorder %s1257_s11, %s1253_s10  ;;  %p55_p9 = scmp.eq.s32.totalorder %s1269_s14, 0 }
  0x21   : > { %s1628_s25 = smov (%p40_p6, %s38_s25), 0  ;;  %p1070_p0 = scmp.lt.s32.totalorder %s1269_s14, 2 }
  0x22   : > { %p1379_p12 = por %p55_p9, %p54_p4  ;;  %p1385_p13 = por %p1336_p2, %p54_p4 }
  0x23   : > { %s42_s6 = ssub.s32 %s1265_s13, %s1628_s25  ;;  %s146_s7 = sand.u32 1, %s1257_s11  }
  0x24   : > { %p45_p11 = scmp.eq.s32.totalorder %s42_s6, 0  ;;  %s1035_s8 = sshll.u32 %s146_s7, 4 }
  0x25   : > { %s1047_s16 = sshll.u32 %s1265_s13, 8  ;;  %s150_s26 = scalar_lea.vmem [#allocation2], %s1035_s8 }
  0x26   : > { %s1394_s15 = scalar_select %p45_p11, %s1257_s11, %s47_s3  }
  0x27   : > { %s158_s24 = scalar_lea.hbm %s1606_s0, %s1047_s16  ;;  %s159_s27 = sshll.u32 %s150_s26, 4  ;;  %s160_s27 = int_to_ptr.vmem [resolvable:$true] %s159_s27 }
  0x28   : > { %p1402_p2 = pnand %p1070_p0, %p1379_p12  ;;  %s147_s28 = scalar_lea.sflag [#allocation3], %s146_s7 }
  0x29   : > { %s1170_s29 = scalar_lea.vmem %s160_s27, 256  ;;  %s1274_s30 = smov [#allocation2]  }
  0x2a   : > { %p1159_p3 = pneg %p1402_p2  ;;  %p1171_p5 = scmp.ne.s32.totalorder %s160_s27, %s1170_s29 }
  0x2b   : > { %s1175_s3 = sshll.u32 %s1274_s30, 4  ;;  %s1176_s3 = int_to_ptr.vmem [resolvable:$false] %s1175_s3 }
  0x2c   : > { %p1173_p7 = pnand %p1171_p5, %p1159_p3  ;;  %s1177_s6 = scalar_lea.vmem %s1176_s3, 512 }
  0x2d   : > { %p1178_p4 = scmp.lt.s32.totalorder %s160_s27, %s1176_s3  ;;  %p1179_p9 = scmp.lt.s32.totalorder %s1177_s6, %s1170_s29 }
  0x2e   : > { %p1174_p6 = pneg %p1173_p7 }
  0x2f   : > { %p1180_p11 = por %p1179_p9, %p1178_p4 }
  0x31   : > { %p1181_p10 = pnand %p1180_p11, %p1174_p6 }
  0x33   : > { %1184 = shalt.err (!%p1181_p10)
}
  0x34   : > { %s1275_s4 = smov 64   ;;  %s1276_s8 = smov 4  }
  0x35   : > { %1064 = dma.hbm_to_vmem [thread:$0]  (!%p1402_p2), %s158_s24, 256, %s160_s27, %s147_s28, %s1275_s4, %s1275_s4, %s1276_s8  }
  0x36   : > { %171 = sbr.rel (%p1352_p8) target bundleno = 334 (0x14e), region = 28  ;;  %s1413_s7 = sand.u32 (!%p1352_p8), 1, %s1253_s10  }
  0x37   : > { %s1039_s16 = sshll.u32 (!%p1352_p8), %s1413_s7, 4  ;;  %s174_s22 = scalar_lea.sflag (!%p1352_p8), [#allocation3], %s1413_s7 }
  0x38   : > { %s1417_s23 = scalar_lea.vmem (!%p1352_p8), [#allocation2], %s1039_s16  ;;  %p1619_p12 = scmp.ne.s32.totalorder (!%p1352_p8), %s1612_s19, 0 }
  0x3b   : > { %1236 = dma.done.wait (%p1619_p12), %s174_s22, 256  }
  0x3c   : > { %1238 = vsyncadd (%p1619_p12), %s174_s22, 4294967040 }
  0x3d   : > { %1240 = dma.done.wait (%p1332_p1), [#allocation6], 8192  }
  0x3e   : > { %1242 = vsyncadd (%p1332_p1), [#allocation6], 4294959104  ;;  %v1277_v0 = vmov 0.0   ;;  %v631_v1 = vld [vmem:[#allocation5 + $0x1e8] sm:$0xff]  ;;  %v633_v2 = vld [vmem:[#allocation5 + $0x1f8] sm:$0xff]  ;;  %v265_v35 = vlaneseq  ;;  %vm220_vm0 = vcmask 1040384  }
  0x3f   : > { %786 = vmatprep.mubr.f32.mxu0 %v1277_v0  ;;  %875 = vmatprep.mubr.f32.mxu1 %v1277_v0  ;;  %v630_v3 = vld [vmem:[#allocation5 + $0x1e0] sm:$0xff]  ;;  %v632_v4 = vld [vmem:[#allocation5 + $0x1f0] sm:$0xff]  ;;  %v627_v5 = vld [vmem:[#allocation5 + $0x1c8] sm:$0xff]  ;;  %v1278_v33 = vmov 1966171168   ;;  %vm233_vm1 = vcmask 1042432  }
  0x40   : > { %722 = vmatprep.subr.mxu0 %v631_v1  ;;  %811 = vmatprep.subr.mxu1 %v633_v2  ;;  %v629_v6 = vld [vmem:[#allocation5 + $0x1d8] sm:$0xff]  ;;  %v626_v7 = vld [vmem:[#allocation5 + $0x1c0] sm:$0xff]  ;;  %v628_v8 = vld [vmem:[#allocation5 + $0x1d0] sm:$0xff]  ;;  %v263_v34 = vunpack.c.l.s4 %v1278_v33  ;;  %v1429_v45 = vshrl.u32 %v265_v35, 7  ;;  %v1279_v46 = vmov 1983009808  }
  0x41   : > { %723 = vmatpush1.msra.mxu0 %v630_v3  ;;  %812 = vmatpush1.msra.mxu1 %v632_v4  ;;  %v623_v9 = vld [vmem:[#allocation5 + $0x1a8] sm:$0xff]  ;;  %v625_v10 = vld [vmem:[#allocation5 + $0x1b8] sm:$0xff]  ;;  %v622_v11 = vld [vmem:[#allocation5 + $0x1a0] sm:$0xff]  ;;  %v1431_v47 = vunpack.c.l.s4 %v1279_v46  ;;  %s1041_s17 = sshll.u32 %s1413_s7, 7  ;;  %s1048_s21 = sshll.u32 %s1261_s12, 11 }
  0x42   : > { %724 = vmatprep.subr.mxu0 %v627_v5  ;;  %813 = vmatprep.subr.mxu1 %v629_v6  ;;  %v624_v12 = vld [vmem:[#allocation5 + $0x1b0] sm:$0xff]  ;;  %v619_v13 = vld [vmem:[#allocation5 + $0x188] sm:$0xff]  ;;  %v621_v14 = vld [vmem:[#allocation5 + $0x198] sm:$0xff]  ;;  %v264_v44 = vunpack.c.0.s8 %v263_v34  ;;  %v1458_v46 = vsub.s32 0, %v1429_v45  ;;  %s1533_s19 = scalar_lea.vmem [#allocation7], %s1041_s17  ;;  %s1552_s18 = scalar_lea.hbm %s1608_s2, %s1048_s21 }
  0x43   : > { %725 = vmatpush1.msra.mxu0 %v626_v7  ;;  %814 = vmatpush1.msra.mxu1 %v628_v8  ;;  %v618_v15 = vld [vmem:[#allocation5 + $0x180] sm:$0xff]  ;;  %v620_v16 = vld [vmem:[#allocation5 + $0x190] sm:$0xff]  ;;  %v615_v17 = vld [vmem:[#allocation5 + $0x168] sm:$0xff]  ;;  %v654_v60 = vunpack.c.0.s8 %v1431_v47  ;;  %s933_s24 = sshll.u32 %s1533_s19, 4  ;;  %s917_s12 = scalar_lea.sflag [#allocation4], %s1413_s7  ;;  %s1554_s24 = int_to_ptr.vmem [resolvable:$true] %s933_s24 }
  0x44   : > { %726 = vmatprep.subr.mxu0 %v623_v9  ;;  %815 = vmatprep.subr.mxu1 %v625_v10  ;;  %v617_v18 = vld [vmem:[#allocation5 + $0x178] sm:$0xff]  ;;  %v614_v19 = vld [vmem:[#allocation5 + $0x160] sm:$0xff]  ;;  %v616_v20 = vld [vmem:[#allocation5 + $0x170] sm:$0xff]  ;;  %v1435_v59 = vsub.s32 %v264_v44, %v1429_v45  ;;  %s1185_s28 = scalar_lea.vmem %s1554_s24, 2048  ;;  %s1280_s29 = smov [#allocation7]  }
  0x45   : > { %727 = vmatpush1.msra.mxu0 %v622_v11  ;;  %816 = vmatpush1.msra.mxu1 %v624_v12  ;;  %v611_v21 = vld [vmem:[#allocation5 + $0x148] sm:$0xff]  ;;  %v613_v22 = vld [vmem:[#allocation5 + $0x158] sm:$0xff]  ;;  %v610_v23 = vld [vmem:[#allocation5 + $0x140] sm:$0xff]  ;;  %p1186_p1 = scmp.ne.s32.totalorder %s1554_s24, %s1185_s28  ;;  %s1189_s30 = sshll.u32 %s1280_s29, 4  ;;  %s1190_s30 = int_to_ptr.vmem [resolvable:$false] %s1189_s30 }
  0x46   : > { %728 = vmatprep.subr.mxu0 %v619_v13  ;;  %817 = vmatprep.subr.mxu1 %v621_v14  ;;  %v612_v24 = vld [vmem:[#allocation5 + $0x150] sm:$0xff]  ;;  %v607_v25 = vld [vmem:[#allocation5 + $0x128] sm:$0xff]  ;;  %v609_v26 = vld [vmem:[#allocation5 + $0x138] sm:$0xff]  ;;  %s1191_s3 = scalar_lea.vmem %s1190_s30, 4096  ;;  %p1192_p0 = scmp.lt.s32.totalorder %s1554_s24, %s1190_s30 }
  0x47   : > { %729 = vmatpush1.msra.mxu0 %v618_v15  ;;  %818 = vmatpush1.msra.mxu1 %v620_v16  ;;  %v606_v27 = vld [vmem:[#allocation5 + $0x120] sm:$0xff]  ;;  %v608_v28 = vld [vmem:[#allocation5 + $0x130] sm:$0xff]  ;;  %v603_v29 = vld [vmem:[#allocation5 + $0x108] sm:$0xff]  ;;  %p1187_p8 = pnand %p1186_p1, %p1385_p13  ;;  %p1193_p2 = scmp.lt.s32.totalorder %s1191_s3, %s1185_s28 }
  0x48   : > { %730 = vmatprep.subr.mxu0 %v615_v17  ;;  %819 = vmatprep.subr.mxu1 %v617_v18  ;;  %v605_v30 = vld [vmem:[#allocation5 + $0x118] sm:$0xff]  ;;  %v602_v31 = vld [vmem:[#allocation5 + $0x100] sm:$0xff]  ;;  %v604_v32 = vld [vmem:[#allocation5 + $0x110] sm:$0xff] }
  0x49   : > { %731 = vmatpush1.msra.mxu0 %v614_v19  ;;  %820 = vmatpush1.msra.mxu1 %v616_v20  ;;  %v599_v36 = vld [vmem:[#allocation5 + $0xe8] sm:$0xff]  ;;  %v601_v37 = vld [vmem:[#allocation5 + $0xf8] sm:$0xff]  ;;  %v598_v38 = vld [vmem:[#allocation5 + $0xe0] sm:$0xff]  ;;  %p1188_p10 = pneg %p1187_p8  ;;  %p1194_p3 = por %p1193_p2, %p1192_p0 }
  0x4a   : > { %732 = vmatprep.subr.mxu0 %v611_v21  ;;  %821 = vmatprep.subr.mxu1 %v613_v22  ;;  %v600_v39 = vld [vmem:[#allocation5 + $0xf0] sm:$0xff]  ;;  %v595_v40 = vld [vmem:[#allocation5 + $0xc8] sm:$0xff]  ;;  %v597_v41 = vld [vmem:[#allocation5 + $0xd8] sm:$0xff] }
  0x4b   : > { %733 = vmatpush1.msra.mxu0 %v610_v23  ;;  %822 = vmatpush1.msra.mxu1 %v612_v24  ;;  %v594_v42 = vld [vmem:[#allocation5 + $0xc0] sm:$0xff]  ;;  %v596_v43 = vld [vmem:[#allocation5 + $0xd0] sm:$0xff]  ;;  %v591_v48 = vld [vmem:[#allocation5 + $0xa8] sm:$0xff]  ;;  %p1195_p5 = pnand %p1194_p3, %p1188_p10 }
  0x4c   : > { %734 = vmatprep.subr.mxu0 %v607_v25  ;;  %823 = vmatprep.subr.mxu1 %v609_v26  ;;  %v593_v49 = vld [vmem:[#allocation5 + $0xb8] sm:$0xff]  ;;  %v590_v50 = vld [vmem:[#allocation5 + $0xa0] sm:$0xff]  ;;  %v592_v51 = vld [vmem:[#allocation5 + $0xb0] sm:$0xff] }
  0x4d   : > { %735 = vmatpush1.msra.mxu0 %v606_v27  ;;  %824 = vmatpush1.msra.mxu1 %v608_v28  ;;  %v587_v52 = vld [vmem:[#allocation5 + $0x88] sm:$0xff]  ;;  %v589_v53 = vld [vmem:[#allocation5 + $0x98] sm:$0xff]  ;;  %v586_v54 = vld [vmem:[#allocation5 + $0x80] sm:$0xff] }
  0x4e   : > { %736 = vmatprep.subr.mxu0 %v603_v29  ;;  %825 = vmatprep.subr.mxu1 %v605_v30  ;;  %v588_v55 = vld [vmem:[#allocation5 + $0x90] sm:$0xff]  ;;  %v583_v56 = vld [vmem:[#allocation5 + $0x68] sm:$0xff]  ;;  %v585_v57 = vld [vmem:[#allocation5 + $0x78] sm:$0xff] }
  0x4f   : > { %737 = vmatpush1.msra.mxu0 %v602_v31  ;;  %826 = vmatpush1.msra.mxu1 %v604_v32  ;;  %v204_v58 = vld [vmem:[%s1417_s23] sm:$0xf]  ;;  %v205_v61 = vld [vmem:[%s1417_s23 + $0x4] sm:$0xf]  ;;  %v206_v3 = vld [vmem:[%s1417_s23 + $0x8] sm:$0xf] }
  0x50   : > { %738 = vmatprep.subr.mxu0 %v599_v36  ;;  %827 = vmatprep.subr.mxu1 %v601_v37  ;;  %v212_v62 = vrot.slane %v204_v58, 7  ;;  %v225_v63 = vrot.slane %v204_v58, 1  ;;  %v242_v1 = vmul.f32 0.75, %v204_v58  ;;  %v213_v2 = vrot.slane %v205_v61, 7  ;;  %v582_v4 = vld [vmem:[#allocation5 + $0x60] sm:$0xff]  ;;  %v584_v5 = vld [vmem:[#allocation5 + $0x70] sm:$0xff] }
  0x51   : > { %739 = vmatpush1.msra.mxu0 %v598_v38  ;;  %828 = vmatpush1.msra.mxu1 %v600_v39  ;;  %v226_v6 = vrot.slane %v205_v61, 1  ;;  %v243_v7 = vmul.f32 0.75, %v205_v61  ;;  %v214_v8 = vrot.slane %v206_v3, 7  ;;  %v227_v9 = vrot.slane %v206_v3, 1  ;;  %v579_v10 = vld [vmem:[#allocation5 + $0x48] sm:$0xff]  ;;  %v581_v11 = vld [vmem:[#allocation5 + $0x58] sm:$0xff] }
  0x52   : > { %740 = vmatprep.subr.mxu0 %v595_v40  ;;  %829 = vmatprep.subr.mxu1 %v597_v41  ;;  %v578_v12 = vld [vmem:[#allocation5 + $0x40] sm:$0xff]  ;;  %v221_v13 = vsel %vm220_vm0, %v204_v58, %v212_v62  ;;  %v234_v14 = vsel %vm233_vm1, %v225_v63, %v204_v58  ;;  %v222_v15 = vsel %vm220_vm0, %v205_v61, %v213_v2  ;;  %v244_v16 = vmul.f32 0.75, %v206_v3  ;;  %v580_v17 = vld [vmem:[#allocation5 + $0x50] sm:$0xff]  ;;  %v1445_v22 = vld [vmem:[%s1417_s23 + $0xc] sm:$0xf] }
  0x53   : > { %741 = vmatpush1.msra.mxu0 %v594_v42  ;;  %830 = vmatpush1.msra.mxu1 %v596_v43  ;;  %v238_v18 = vmul.f32 0.25, %v221_v13  ;;  %v250_v19 = vmul.f32 0.25, %v234_v14  ;;  %v235_v20 = vsel %vm233_vm1, %v226_v6, %v205_v61  ;;  %v239_v21 = vmul.f32 0.25, %v222_v15  ;;  %v575_v23 = vld [vmem:[#allocation5 + $0x28] sm:$0xff]  ;;  %v577_v24 = vld [vmem:[#allocation5 + $0x38] sm:$0xff]  ;;  %v574_v29 = vld [vmem:[#allocation5 + $0x20] sm:$0xff] }
  0x54   : > { %742 = vmatprep.subr.mxu0 %v591_v48  ;;  %831 = vmatprep.subr.mxu1 %v593_v49  ;;  %v251_v25 = vmul.f32 0.25, %v235_v20  ;;  %v223_v26 = vsel %vm220_vm0, %v206_v3, %v214_v8  ;;  %v236_v27 = vsel %vm233_vm1, %v227_v9, %v206_v3  ;;  %v215_v28 = vrot.slane %v1445_v22, 7  ;;  %v576_v30 = vld [vmem:[#allocation5 + $0x30] sm:$0xff]  ;;  %v571_v35 = vld [vmem:[#allocation5 + $0x8] sm:$0xff]  ;;  %v573_v36 = vld [vmem:[#allocation5 + $0x18] sm:$0xff] }
  0x55   : > { %743 = vmatpush1.msra.mxu0 %v590_v50  ;;  %832 = vmatpush1.msra.mxu1 %v592_v51  ;;  %v246_v31 = vadd.f32 %v242_v1, %v238_v18  ;;  %v254_v32 = vadd.f32 %v250_v19, %v242_v1  ;;  %v247_v33 = vadd.f32 %v243_v7, %v239_v21  ;;  %v240_v34 = vmul.f32 0.25, %v223_v26  ;;  %v570_v41 = vld [vmem:[#allocation5] sm:$0xff]  ;;  %v572_v42 = vld [vmem:[#allocation5 + $0x10] sm:$0xff] }
  0x56   : > { %744 = vmatprep.subr.mxu0 %v587_v52  ;;  %833 = vmatprep.subr.mxu1 %v589_v53  ;;  %v1451_v37 = vsub.s32 %v654_v60, %v1429_v45  ;;  %v255_v38 = vadd.f32 %v251_v25, %v243_v7  ;;  %v252_v39 = vmul.f32 0.25, %v236_v27  ;;  %v224_v40 = vsel %vm220_vm0, %v1445_v22, %v215_v28 }
  0x57   : > { %745 = vmatpush1.msra.mxu0 %v586_v54  ;;  %834 = vmatpush1.msra.mxu1 %v588_v55  ;;  %v268_v43 = vrot.slane %v246_v31, %v1435_v59  ;;  %v384_v44 = vrot.slane %v254_v32, %v1435_v59  ;;  %v292_v47 = vrot.slane %v247_v33, %v1435_v59  ;;  %v228_v51 = vrot.slane %v1445_v22, 1 }
  0x58   : > { %746 = vmatprep.subr.mxu0 %v583_v56  ;;  %835 = vmatprep.subr.mxu1 %v585_v57  ;;  %v408_v48 = vrot.slane %v255_v38, %v1435_v59  ;;  %v248_v49 = vadd.f32 %v244_v16, %v240_v34  ;;  %v256_v50 = vadd.f32 %v252_v39, %v244_v16  ;;  %v241_v55 = vmul.f32 0.25, %v224_v40 }
  0x59   : > { %747 = vmatpush1.msra.mxu0 %v582_v4  ;;  %836 = vmatpush1.msra.mxu1 %v584_v5  ;;  %v269_v52 = vcombine.high %v268_v43, %v268_v43  ;;  %v276_v53 = vrot.slane %v268_v43, %v1435_v59  ;;  %v385_v54 = vcombine.high %v384_v44, %v384_v44  ;;  %v245_v58 = vmul.f32 0.75, %v1445_v22 }
  0x5a   : > { %748 = vmatprep.subr.mxu0 %v579_v10  ;;  %837 = vmatprep.subr.mxu1 %v581_v11  ;;  %v392_v45 = vrot.slane %v384_v44, %v1435_v59  ;;  %v293_v56 = vcombine.high %v292_v47, %v292_v47  ;;  %v300_v57 = vrot.slane %v292_v47, %v1435_v59 }
  0x5b   : > { %749 = vmatpush1.msra.mxu0 %v578_v12  ;;  %838 = vmatpush1.msra.mxu1 %v580_v17  ;;  %v283_v60 = vrot.slane %v269_v52, %v1435_v59  ;;  %v284_v61 = vcombine.high %v276_v53, %v276_v53  ;;  %v399_v62 = vrot.slane %v385_v54, %v1435_v59 }
  0x5c   : > { %750 = vmatprep.subr.mxu0 %v575_v23  ;;  %839 = vmatprep.subr.mxu1 %v577_v24  ;;  %v409_v63 = vcombine.high %v408_v48, %v408_v48  ;;  %v400_v1 = vcombine.high %v392_v45, %v392_v45  ;;  %v477_v2 = vrot.slane %v392_v45, %v1458_v46 }
  0x5d   : > { %751 = vmatpush1.msra.mxu0 %v574_v29  ;;  %840 = vmatpush1.msra.mxu1 %v576_v30  ;;  %v307_v3 = vrot.slane %v293_v56, %v1435_v59  ;;  %v308_v4 = vcombine.high %v300_v57, %v300_v57  ;;  %v285_v5 = vcombine.high %v283_v60, %v283_v60 }
  0x5e   : > { %752 = vmatprep.subr.mxu0 %v571_v35  ;;  %841 = vmatprep.subr.mxu1 %v573_v36  ;;  %v401_v6 = vcombine.high %v399_v62, %v399_v62  ;;  %v481_v7 = vrot.slane %v399_v62, %v1458_v46  ;;  %v416_v8 = vrot.slane %v408_v48, %v1435_v59 }
  0x5f   : > { %753 = vmatpush1.msra.mxu0 %v570_v41  ;;  %842 = vmatpush1.msra.mxu1 %v572_v42  ;;  %v485_v9 = vrot.slane %v400_v1, %v1458_v46  ;;  %v554_v10 = vsel %vm220_vm0, %v276_v53, %v477_v2  ;;  %v309_v11 = vcombine.high %v307_v3, %v307_v3 }
  0x60   : > { %v423_v12 = vrot.slane %v409_v63, %v1435_v59  ;;  %v489_v13 = vrot.slane %v401_v6, %v1458_v46  ;;  %v555_v14 = vsel %vm220_vm0, %v283_v60, %v481_v7  ;;  %v424_v15 = vcombine.high %v416_v8, %v416_v8 }
  0x61   : > { %v493_v16 = vrot.slane %v416_v8, %v1458_v46  ;;  %v556_v17 = vsel %vm220_vm0, %v284_v61, %v485_v9  ;;  %v650_v18 = vcombine.low %v554_v10, %v555_v14  ;;  %v316_v25 = vrot.slane %v248_v49, %v1435_v59 }
  0x62   : > { %v425_v19 = vcombine.high %v423_v12, %v423_v12  ;;  %v497_v20 = vrot.slane %v423_v12, %v1458_v46  ;;  %v557_v21 = vsel %vm220_vm0, %v285_v5, %v489_v13  ;;  %v501_v23 = vrot.slane %v424_v15, %v1458_v46 }
  0x63   : > { %v558_v24 = vsel %vm220_vm0, %v300_v57, %v493_v16  ;;  %v651_v26 = vcombine.low %v556_v17, %v557_v21  ;;  %v658_v27 = vrot.slane %v650_v18, %v1451_v37  ;;  %v317_v32 = vcombine.high %v316_v25, %v316_v25 }
  0x64   : > { %v505_v28 = vrot.slane %v425_v19, %v1458_v46  ;;  %v559_v29 = vsel %vm220_vm0, %v307_v3, %v497_v20  ;;  %v560_v30 = vsel %vm220_vm0, %v308_v4, %v501_v23  ;;  %v324_v33 = vrot.slane %v316_v25, %v1435_v59 }
  0x65   : > { %v667_v31 = vcombine.low %v558_v24, %v559_v29  ;;  %v665_v34 = vrot.slane %v651_v26, %v1451_v37  ;;  %v432_v36 = vrot.slane %v256_v50, %v1435_v59  ;;  %v237_v38 = vsel %vm233_vm1, %v228_v51, %v1445_v22 }
  0x66   : > { %v561_v35 = vsel %vm220_vm0, %v309_v11, %v505_v28  ;;  %v331_v41 = vrot.slane %v317_v32, %v1435_v59  ;;  %v249_v47 = vadd.f32 %v245_v58, %v241_v55  ;;  %v332_v49 = vcombine.high %v324_v33, %v324_v33 }
  0x67   : > { %v668_v39 = vcombine.low %v560_v30, %v561_v35  ;;  %v675_v40 = vrot.slane %v667_v31, %v1451_v37  ;;  %v666_v42 = vcombine.low %v658_v27, %v665_v34  ;;  %v433_v43 = vcombine.high %v432_v36, %v432_v36 }
  0x68   : > { %v440_v44 = vrot.slane %v432_v36, %v1435_v59  ;;  %v333_v52 = vcombine.high %v331_v41, %v331_v41  ;;  %v253_v53 = vmul.f32 0.25, %v237_v38  ;;  %v340_v55 = vrot.slane %v249_v47, %v1435_v59 }
  0x69   : > { %v682_v48 = vrot.slane %v668_v39, %v1451_v37  ;;  %787 = vmatmul.mubr.f32.vlgmr.msra.gmra.mxu0 %v666_v42  ;;  %876 = vmatmul.mubr.f32.vlgmr.msra.gmra.mxu1 %v666_v42  ;;  %v447_v50 = vrot.slane %v433_v43, %v1435_v59 }
  0x6a   : > { %v448_v22 = vcombine.high %v440_v44, %v440_v44  ;;  %v509_v51 = vrot.slane %v440_v44, %v1458_v46  ;;  %792 = vmatprep.mubr.f32.mxu0 %v1277_v0  ;;  %881 = vmatprep.mubr.f32.mxu1 %v1277_v0  ;;  %v257_v45 = vadd.f32 %v253_v53, %v245_v58 }
  0x6b   : > { %v683_v54 = vcombine.low %v675_v40, %v682_v48  ;;  %v449_v56 = vcombine.high %v447_v50, %v447_v50  ;;  %v513_v57 = vrot.slane %v447_v50, %v1458_v46  ;;  %v341_v62 = vcombine.high %v340_v55, %v340_v55 }
  0x6c   : > { %v517_v60 = vrot.slane %v448_v22, %v1458_v46  ;;  %v562_v61 = vsel %vm220_vm0, %v324_v33, %v509_v51  ;;  %v348_v63 = vrot.slane %v340_v55, %v1435_v59  ;;  %v456_v1 = vrot.slane %v257_v45, %v1435_v59 }
  0x6d   : > { %793 = vmatmul.mubr.f32.gmra.mxu0 %v683_v54  ;;  %882 = vmatmul.mubr.f32.gmra.mxu1 %v683_v54  ;;  %v521_v2 = vrot.slane %v449_v56, %v1458_v46  ;;  %v563_v58 = vsel %vm220_vm0, %v331_v41, %v513_v57  ;;  %v355_v5 = vrot.slane %v341_v62, %v1435_v59 }
  0x6e   : > { %v564_v3 = vsel %vm220_vm0, %v332_v49, %v517_v60  ;;  %798 = vmatprep.mubr.f32.mxu0 %v1277_v0  ;;  %887 = vmatprep.mubr.f32.mxu1 %v1277_v0  ;;  %v684_v4 = vcombine.low %v562_v61, %v563_v58  ;;  %v457_v7 = vcombine.high %v456_v1, %v456_v1 }
  0x6f   : > { %v565_v6 = vsel %vm220_vm0, %v333_v52, %v521_v2  ;;  %v464_v8 = vrot.slane %v456_v1, %v1435_v59  ;;  %v356_v11 = vcombine.high %v348_v63, %v348_v63  ;;  %v357_v16 = vcombine.high %v355_v5, %v355_v5 }
  0x70   : > { %v685_v9 = vcombine.low %v564_v3, %v565_v6  ;;  %v692_v10 = vrot.slane %v684_v4, %v1451_v37  ;;  %v471_v12 = vrot.slane %v457_v7, %v1435_v59 }
  0x71   : > { %v472_v13 = vcombine.high %v464_v8, %v464_v8  ;;  %v525_v14 = vrot.slane %v464_v8, %v1458_v46 }
  0x72   : > { %v699_v15 = vrot.slane %v685_v9, %v1451_v37  ;;  %v473_v17 = vcombine.high %v471_v12, %v471_v12  ;;  %v529_v18 = vrot.slane %v471_v12, %v1458_v46 }
  0x73   : > { %v533_v19 = vrot.slane %v472_v13, %v1458_v46  ;;  %v566_v20 = vsel %vm220_vm0, %v348_v63, %v525_v14 }
  0x74   : > { %v700_v21 = vcombine.low %v692_v10, %v699_v15  ;;  %v537_v23 = vrot.slane %v473_v17, %v1458_v46  ;;  %v567_v24 = vsel %vm220_vm0, %v355_v5, %v529_v18 }
  0x75   : > { %v568_v59 = vsel %vm220_vm0, %v356_v11, %v533_v19  ;;  %v701_v25 = vcombine.low %v566_v20, %v567_v24 }
  0x76   : > { %799 = vmatmul.mubr.f32.gmra.mxu0 %v700_v21  ;;  %888 = vmatmul.mubr.f32.gmra.mxu1 %v700_v21  ;;  %v569_v26 = vsel %vm220_vm0, %v357_v16, %v537_v23 }
  0x77   : > { %804 = vmatprep.mubr.f32.mxu0 %v1277_v0  ;;  %893 = vmatprep.mubr.f32.mxu1 %v1277_v0  ;;  %v702_v27 = vcombine.low %v568_v59, %v569_v26  ;;  %v709_v28 = vrot.slane %v701_v25, %v1451_v37 }
  0x79   : > { %v716_v29 = vrot.slane %v702_v27, %v1451_v37 }
  0x7b   : > { %v717_v30 = vcombine.low %v709_v28, %v716_v29 }
  0x7d   : > { %805 = vmatmul.mubr.f32.gmra.mxu0 %v717_v30  ;;  %894 = vmatmul.mubr.f32.gmra.mxu1 %v717_v30 }
 0x129   : > { %v788_v46 = vpop.f32.mrf.mxu0  ;;  %v877_v31 = vpop.f32.mrf.mxu1 }
 0x12a   : > { %900 = vst [vmem:[%s1533_s19] sm:$0xff] %v788_v46  ;;  %902 = vst [vmem:[%s1533_s19 + $0x10] sm:$0xff] %v877_v31 }
 0x12b   : > { %v790_v0 = vpop.f32.mrf.mxu0  ;;  %v879_v37 = vpop.f32.mrf.mxu1 }
 0x12c   : > { %901 = vst [vmem:[%s1533_s19 + $0x8] sm:$0xff] %v790_v0  ;;  %903 = vst [vmem:[%s1533_s19 + $0x18] sm:$0xff] %v879_v37 }
 0x12d   : > { %v794_v32 = vpop.f32.mrf.mxu0  ;;  %v883_v33 = vpop.f32.mrf.mxu1 }
 0x12e   : > { %904 = vst [vmem:[%s1533_s19 + $0x20] sm:$0xff] %v794_v32  ;;  %906 = vst [vmem:[%s1533_s19 + $0x30] sm:$0xff] %v883_v33 }
 0x12f   : > { %v796_v34 = vpop.f32.mrf.mxu0  ;;  %v885_v35 = vpop.f32.mrf.mxu1 }
 0x130   : > { %905 = vst [vmem:[%s1533_s19 + $0x28] sm:$0xff] %v796_v34  ;;  %907 = vst [vmem:[%s1533_s19 + $0x38] sm:$0xff] %v885_v35 }
 0x136   : > { %v800_v36 = vpop.f32.mrf.mxu0  ;;  %v889_v38 = vpop.f32.mrf.mxu1 }
 0x137   : > { %908 = vst [vmem:[%s1533_s19 + $0x40] sm:$0xff] %v800_v36  ;;  %910 = vst [vmem:[%s1533_s19 + $0x50] sm:$0xff] %v889_v38 }
 0x138   : > { %v802_v39 = vpop.f32.mrf.mxu0  ;;  %v891_v40 = vpop.f32.mrf.mxu1 }
 0x139   : > { %909 = vst [vmem:[%s1533_s19 + $0x48] sm:$0xff] %v802_v39  ;;  %911 = vst [vmem:[%s1533_s19 + $0x58] sm:$0xff] %v891_v40 }
 0x13d   : > { %v806_v41 = vpop.f32.mrf.mxu0  ;;  %v895_v42 = vpop.f32.mrf.mxu1 }
 0x13e   : > { %912 = vst [vmem:[%s1533_s19 + $0x60] sm:$0xff] %v806_v41  ;;  %914 = vst [vmem:[%s1533_s19 + $0x70] sm:$0xff] %v895_v42 }
 0x13f   : > { %v808_v43 = vpop.f32.mrf.mxu0  ;;  %v897_v44 = vpop.f32.mrf.mxu1 }
 0x140   : > { %913 = vst [vmem:[%s1533_s19 + $0x68] sm:$0xff] %v808_v43  ;;  %915 = vst [vmem:[%s1533_s19 + $0x78] sm:$0xff] %v897_v44 }
 0x141   : > { %1198 = shalt.err (!%p1195_p5)
}
 0x142   : > { %s1199_s6 = scalar_lea.hbm %s1552_s18, 2048  ;;  %s1203_s16 = scalar_lea.hbm %s1608_s2, 4096 }
 0x143   : > { %p1200_p7 = scmp.ne.s32.totalorder %s1552_s18, %s1199_s6  ;;  %p1204_p9 = scmp.lt.s32.totalorder %s1552_s18, %s1608_s2 }
 0x144   : > { %p1205_p11 = scmp.lt.s32.totalorder %s1203_s16, %s1199_s6 }
 0x145   : > { %p1201_p6 = pnand %p1200_p7, %p1385_p13 }
 0x146   : > { %p1206_p12 = por %p1205_p11, %p1204_p9 }
 0x147   : > { %p1202_p4 = pneg %p1201_p6 }
 0x149   : > { %p1207_p1 = pnand %p1206_p12, %p1202_p4 }
 0x14b   : > { %1210 = shalt.err (!%p1207_p1)
}
 0x14c   : > { %s1281_s17 = smov 512   ;;  %s1282_s19 = smov 32  }
 0x14d   : > { %1055 = dma.vmem_to_hbm [thread:$0]  (%p1385_p13), %s1554_s24, 2048, %s1552_s18, %s917_s12, %s1281_s17, %s1281_s17, %s1282_s19  }
 0x14e PF: > { %s948_s21 = sand.u32 1, %s1249_s9   ;;  %p1620_p8 = scmp.ne.s32.totalorder %s1613_s20, 0 }
 0x14f   : > { %p1621_p10 = scmp.ge.s32.totalorder %s1269_s14, 2  ;;  %s949_s26 = scalar_lea.sflag [#allocation4], %s948_s21 }
 0x151   : > { %p1066_p0 = pnand %p1621_p10, %p1620_p8 }
 0x153   : > { %p1067_p2 = pneg %p1066_p0 }
 0x155   : > { %1244 = dma.done.wait (%p1067_p2), %s949_s26, 2048  }
 0x156   : > { %1246 = vsyncadd (%p1067_p2), %s949_s26, 4294965248  ;;  %s19_s14 = sadd.s32 1, %s1269_s14   ;;  %s1622_s9 = smov %s1253_s10 }
 0x157   : > { %p16_p3 = scmp.ge.s32.totalorder %s19_s14, 4   ;;  %s1623_s10 = smov %s1257_s11 }
 0x158   : > { %s1624_s11 = smov %s1394_s15  ;;  %s1625_s12 = smov %s1265_s13 }
 0x159   : > { %s1626_s13 = smov %s1628_s25  ;;  %18 = sbr.rel (!%p16_p3) target bundleno = 7 (0x7), region = 77 }
 0x15e   :  { %954 = vsyncpa [#allocation3], 1 }
 0x15f   :  { %956 = vsyncpa [#allocation3 + $0x1], 1 }
 0x160   :  { %957 = vsyncpa [#allocation6], 1 }
 0x161   :  { %958 = vsyncpa [#allocation4], 1 }
 0x162   :  { %960 = vsyncpa [#allocation4 + $0x1], 1 }

</bundles_post_ra>
